<compile_context>
chip_gen: v6e
topology: v6e:2x2x1
jax: 0.10.0
libtpu: 0.0.40
codegen_flags: <defaults>
</compile_context>

<pallas_src>
import jax
import jax.numpy as jnp
from jax.experimental import pallas as pl
from jax.experimental.pallas import tpu as pltpu


# -----------------------------------------------------------------------------
# Kernel: fused CBAM for one batch element.
# Kernel view of x is (T, C)  (== torch's (C, T) transposed).
#   channel attention pools over T (axis 0), spatial attention pools over C
#   (axis 1).
# -----------------------------------------------------------------------------
def _cbam_kernel(x_ref, w1t_ref, w2t_ref, wsp_ref, o_ref):
    x = x_ref[...]                                   # (T, C)
    t_dim, c_dim = x.shape
    inv_t = 1.0 / t_dim                              # compile-time constants
    inv_c = 1.0 / c_dim

    # ---- channel attention ------------------------------------------------
    mx = jnp.max(x, axis=0, keepdims=True)           # (1, C)  AdaptiveMaxPool1d(1)
    av = jnp.sum(x, axis=0, keepdims=True) * inv_t   # (1, C)  AdaptiveAvgPool1d(1)
    pooled = jnp.concatenate([mx, av], axis=0)       # (2, C)  one MLP pass for both

    # mlp: Conv1d(C -> C/r, 1) -> ReLU -> Conv1d(C/r -> C, 1), no bias
    h = jnp.maximum(
        jnp.dot(pooled, w1t_ref[...], preferred_element_type=jnp.float32), 0.0)
    mlp_out = jnp.dot(h, w2t_ref[...], preferred_element_type=jnp.float32)  # (2, C)

    ch_gate = jax.nn.sigmoid(mlp_out[0:1, :] + mlp_out[1:2, :])             # (1, C)
    x = ch_gate * x

    # ---- spatial attention -------------------------------------------------
    smax = jnp.max(x, axis=1, keepdims=True)          # (T, 1) max over channels
    savg = jnp.sum(x, axis=1, keepdims=True) * inv_c  # (T, 1) mean over channels
    # Conv1d(2 -> 1, k=1, bias=False) on cat([max, avg]) == weighted sum
    sp_gate = jax.nn.sigmoid(wsp_ref[0, 0] * smax + wsp_ref[0, 1] * savg)   # (T, 1)

    o_ref[...] = sp_gate * x                          # lane-dense (T, C) store


def cbam_channels_last(x_btc, w1t, w2t, wsp):
    """x_btc: (B, T, C) float32.  w1t: (C, C//r), w2t: (C//r, C), wsp: (1, 2)."""
    B, T, C = x_btc.shape
    R = w1t.shape[1]
    return pl.pallas_call(
        _cbam_kernel,
        out_shape=jax.ShapeDtypeStruct((B, T, C), jnp.float32),
        grid_spec=pltpu.PrefetchScalarGridSpec(
            num_scalar_prefetch=0,
            grid=(B,),
            in_specs=[
                pl.BlockSpec((None, T, C), lambda b: (b, 0, 0)),   # per-b block
                pl.BlockSpec((C, R), lambda b: (0, 0)),
                pl.BlockSpec((R, C), lambda b: (0, 0)),
                pl.BlockSpec((1, 2), lambda b: (0, 0)),
            ],
            out_specs=pl.BlockSpec((None, T, C), lambda b: (b, 0, 0)),
        ),
        compiler_params=pltpu.CompilerParams(
            dimension_semantics=("parallel",)),       # megacore-shardable on v7x
    )(x_btc, w1t, w2t, wsp)


def cbam_layer(x_bct, mlp_w1, mlp_w2, spatial_w):
    """PyTorch-layout entry point, matching CBAMLayer.forward.

    x_bct:      (B, C, T)        -- like nn.Conv1d input
    mlp_w1:     (C//r, C)        -- mlp[0].weight.squeeze(-1)
    mlp_w2:     (C, C//r)        -- mlp[2].weight.squeeze(-1)
    spatial_w:  (1, 2)           -- conv.weight.squeeze(-1)  ([max, avg] order)
    """
    x_btc = jnp.swapaxes(x_bct, 1, 2)                    # layout plumbing only
    y = cbam_channels_last(x_btc, mlp_w1.T, mlp_w2.T, spatial_w)
    return jnp.swapaxes(y, 1, 2)


# -----------------------------------------------------------------------------
# Pure-JAX reference (mirrors the torch code, channels-first) for verification.
# -----------------------------------------------------------------------------
def cbam_reference(x, mlp_w1, mlp_w2, spatial_w):
    mx = jnp.max(x, axis=2, keepdims=True)               # (B, C, 1)
    av = jnp.mean(x, axis=2, keepdims=True)              # (B, C, 1)

    def mlp(v):
        h = jnp.maximum(jnp.einsum('oc,bct->bot', mlp_w1, v), 0.0)
        return jnp.einsum('co,bot->bct', mlp_w2, h)

    ch = jax.nn.sigmoid(mlp(mx) + mlp(av))               # (B, C, 1)
    x = ch * x
    smax = jnp.max(x, axis=1, keepdims=True)             # (B, 1, T)
    savg = jnp.mean(x, axis=1, keepdims=True)            # (B, 1, T)
    sp = jax.nn.sigmoid(spatial_w[0, 0] * smax + spatial_w[0, 1] * savg)
    return sp * x


if __name__ == "__main__":
    key = jax.random.PRNGKey(0)
    kx, k1, k2, k3 = jax.random.split(key, 4)

    B, C, T = 4, 128, 64          # channel must be >= reduction(=16)
    REDUCTION = 16
    CR = C // REDUCTION           # 8

    x = jax.random.normal(kx, (B, C, T), jnp.float32)
    mlp_w1 = jax.random.normal(k1, (CR, C), jnp.float32) * 0.1   # Conv1d(C, C/r, 1)
    mlp_w2 = jax.random.normal(k2, (C, CR), jnp.float32) * 0.1   # Conv1d(C/r, C, 1)
    spatial_w = jax.random.normal(k3, (1, 2), jnp.float32) * 0.5 # Conv1d(2, 1, 1)

    fwd = jax.jit(cbam_layer)
    out = jax.block_until_ready(fwd(x, mlp_w1, mlp_w2, spatial_w))

    assert out.shape == (B, C, T), out.shape
    ref = cbam_reference(x, mlp_w1, mlp_w2, spatial_w)
    err = float(jnp.max(jnp.abs(out - ref)))
    assert jnp.allclose(out, ref, rtol=1e-4, atol=1e-5), f"max abs err {err}"
    assert bool(jnp.all(jnp.isfinite(out)))
    print("KERNEL_OK")
</pallas_src>

<mosaic_0001>
module attributes {stable_mosaic.version = 11 : i64} {
  func.func @_cbam_kernel(%arg0: i32, %arg1: memref<1x64x128xf32, #tpu.memory_space<vmem>>, %arg2: memref<128x8xf32, #tpu.memory_space<vmem>>, %arg3: memref<8x128xf32, #tpu.memory_space<vmem>>, %arg4: memref<1x2xf32, #tpu.memory_space<vmem>>, %arg5: memref<1x64x128xf32, #tpu.memory_space<vmem>>) attributes {dimension_semantics = [#tpu.dimension_semantics<parallel>], iteration_bounds = array<i64: 4>, scalar_prefetch = 0 : i64, scratch_operands = 0 : i64, tpu.core_type = #tpu.core_type<tc>, window_params = [{transform_indices = @transform_0, window_bounds = array<i64: 1, 64, 128>}, {pipeline_mode = #tpu.pipeline_mode<synchronous>, transform_indices = @transform_1, window_bounds = array<i64: 128, 8>}, {pipeline_mode = #tpu.pipeline_mode<synchronous>, transform_indices = @transform_2, window_bounds = array<i64: 8, 128>}, {pipeline_mode = #tpu.pipeline_mode<synchronous>, transform_indices = @transform_3, window_bounds = array<i64: 1, 2>}, {transform_indices = @transform_4, window_bounds = array<i64: 1, 64, 128>}]} {
    %c0 = arith.constant 0 : index
    %c0_0 = arith.constant 0 : index
    %c0_1 = arith.constant 0 : index
    %0 = vector.load %arg1[%c0, %c0_0, %c0_1] : memref<1x64x128xf32, #tpu.memory_space<vmem>>, vector<1x64x128xf32>
    %1 = vector.shape_cast %0 : vector<1x64x128xf32> to vector<64x128xf32>
    %cst = arith.constant dense<0xFF800000> : vector<128xf32>
    %2 = vector.multi_reduction <maximumf>, %1, %cst [0] : vector<64x128xf32> to vector<128xf32>
    %3 = vector.shape_cast %2 : vector<128xf32> to vector<1x128xf32>
    %cst_2 = arith.constant dense<0.000000e+00> : vector<128xf32>
    %4 = vector.multi_reduction <add>, %1, %cst_2 [0] : vector<64x128xf32> to vector<128xf32>
    %5 = vector.shape_cast %4 : vector<128xf32> to vector<1x128xf32>
    %cst_3 = arith.constant 1.562500e-02 : f32
    %6 = vector.broadcast %cst_3 : f32 to vector<1x128xf32>
    %7 = arith.mulf %5, %6 : vector<1x128xf32>
    %8 = tpu.concatenate %3, %7 in 0 : vector<1x128xf32>, vector<1x128xf32> -> vector<2x128xf32>
    %c0_4 = arith.constant 0 : index
    %c0_5 = arith.constant 0 : index
    %9 = vector.load %arg2[%c0_4, %c0_5] : memref<128x8xf32, #tpu.memory_space<vmem>>, vector<128x8xf32>
    %cst_6 = arith.constant dense<0.000000e+00> : vector<2x8xf32>
    %10 = tpu.matmul %8, %9, %cst_6 {dimension_numbers = #tpu.dot_dimension_numbers<[1], [0], [0], [1], [0, 0, 1, 1], [], []>} : vector<2x128xf32>, vector<128x8xf32>, vector<2x8xf32> -> vector<2x8xf32>
    %cst_7 = arith.constant 0.000000e+00 : f32
    %11 = vector.broadcast %cst_7 : f32 to vector<2x8xf32>
    %12 = arith.maximumf %10, %11 : vector<2x8xf32>
    %c0_8 = arith.constant 0 : index
    %c0_9 = arith.constant 0 : index
    %13 = vector.load %arg3[%c0_8, %c0_9] : memref<8x128xf32, #tpu.memory_space<vmem>>, vector<8x128xf32>
    %cst_10 = arith.constant dense<0.000000e+00> : vector<2x128xf32>
    %14 = tpu.matmul %12, %13, %cst_10 {dimension_numbers = #tpu.dot_dimension_numbers<[1], [0], [0], [1], [0, 0, 1, 1], [], []>} : vector<2x8xf32>, vector<8x128xf32>, vector<2x128xf32> -> vector<2x128xf32>
    %15 = vector.extract_strided_slice %14 {offsets = [0, 0], sizes = [1, 128], strides = [1, 1]} : vector<2x128xf32> to vector<1x128xf32>
    %16 = vector.extract_strided_slice %14 {offsets = [1, 0], sizes = [1, 128], strides = [1, 1]} : vector<2x128xf32> to vector<1x128xf32>
    %17 = arith.addf %15, %16 : vector<1x128xf32>
    %18 = arith.negf %17 : vector<1x128xf32>
    %19 = math.exp %18 : vector<1x128xf32>
    %cst_11 = arith.constant 1.000000e+00 : f32
    %20 = vector.broadcast %cst_11 : f32 to vector<1x128xf32>
    %21 = arith.addf %20, %19 : vector<1x128xf32>
    %22 = arith.divf %20, %21 : vector<1x128xf32>
    %23 = vector.broadcast %22 : vector<1x128xf32> to vector<64x128xf32>
    %24 = arith.mulf %23, %1 : vector<64x128xf32>
    %cst_12 = arith.constant dense<0xFF800000> : vector<64xf32>
    %25 = vector.multi_reduction <maximumf>, %24, %cst_12 [1] : vector<64x128xf32> to vector<64xf32>
    %26 = vector.shape_cast %25 : vector<64xf32> to vector<64x1xf32>
    %cst_13 = arith.constant dense<0.000000e+00> : vector<64xf32>
    %27 = vector.multi_reduction <add>, %24, %cst_13 [1] : vector<64x128xf32> to vector<64xf32>
    %28 = vector.shape_cast %27 : vector<64xf32> to vector<64x1xf32>
    %cst_14 = arith.constant 7.812500e-03 : f32
    %29 = vector.broadcast %cst_14 : f32 to vector<64x1xf32>
    %30 = arith.mulf %28, %29 : vector<64x1xf32>
    %c0_15 = arith.constant 0 : index
    %c0_16 = arith.constant 0 : index
    %31 = vector.load %arg4[%c0_15, %c0_16] : memref<1x2xf32, #tpu.memory_space<vmem>>, vector<1x1xf32>
    %32 = vector.extract %31[0, 0] : f32 from vector<1x1xf32>
    %33 = vector.broadcast %32 : f32 to vector<64x1xf32>
    %34 = arith.mulf %33, %26 : vector<64x1xf32>
    %c0_17 = arith.constant 0 : index
    %c1 = arith.constant 1 : index
    %35 = vector.load %arg4[%c0_17, %c1] : memref<1x2xf32, #tpu.memory_space<vmem>>, vector<1x1xf32>
    %36 = vector.extract %35[0, 0] : f32 from vector<1x1xf32>
    %37 = vector.broadcast %36 : f32 to vector<64x1xf32>
    %38 = arith.mulf %37, %30 : vector<64x1xf32>
    %39 = arith.addf %34, %38 : vector<64x1xf32>
    %40 = arith.negf %39 : vector<64x1xf32>
    %41 = math.exp %40 : vector<64x1xf32>
    %cst_18 = arith.constant 1.000000e+00 : f32
    %42 = vector.broadcast %cst_18 : f32 to vector<64x1xf32>
    %43 = arith.addf %42, %41 : vector<64x1xf32>
    %44 = arith.divf %42, %43 : vector<64x1xf32>
    %45 = vector.broadcast %44 : vector<64x1xf32> to vector<64x128xf32>
    %46 = arith.mulf %45, %24 : vector<64x128xf32>
    %c0_19 = arith.constant 0 : index
    %c0_20 = arith.constant 0 : index
    %c0_21 = arith.constant 0 : index
    %47 = vector.load %arg5[%c0_19, %c0_20, %c0_21] : memref<1x64x128xf32, #tpu.memory_space<vmem>>, vector<1x64x128xf32>
    %48 = vector.shape_cast %47 : vector<1x64x128xf32> to vector<64x128xf32>
    %49 = vector.shape_cast %46 : vector<64x128xf32> to vector<1x64x128xf32>
    tpu.vector_store %arg5[%c0_19, %c0_20, %c0_21], %49 {strides = array<i32>} : memref<1x64x128xf32, #tpu.memory_space<vmem>>, vector<1x64x128xf32>,
    return
  }
  func.func @transform_0(%arg0: i32) -> (i32, i32, i32) {
    %c0_i32 = arith.constant 0 : i32
    %c0_i32_0 = arith.constant 0 : i32
    %c0_i32_1 = arith.constant 0 : i32
    return %arg0, %c0_i32, %c0_i32_0 : i32, i32, i32
  }
  func.func @transform_1(%arg0: i32) -> (i32, i32) {
    %c0_i32 = arith.constant 0 : i32
    %c0_i32_0 = arith.constant 0 : i32
    %c0_i32_1 = arith.constant 0 : i32
    return %c0_i32, %c0_i32_0 : i32, i32
  }
  func.func @transform_2(%arg0: i32) -> (i32, i32) {
    %c0_i32 = arith.constant 0 : i32
    %c0_i32_0 = arith.constant 0 : i32
    %c0_i32_1 = arith.constant 0 : i32
    return %c0_i32, %c0_i32_0 : i32, i32
  }
  func.func @transform_3(%arg0: i32) -> (i32, i32) {
    %c0_i32 = arith.constant 0 : i32
    %c0_i32_0 = arith.constant 0 : i32
    %c0_i32_1 = arith.constant 0 : i32
    return %c0_i32, %c0_i32_0 : i32, i32
  }
  func.func @transform_4(%arg0: i32) -> (i32, i32, i32) {
    %c0_i32 = arith.constant 0 : i32
    %c0_i32_0 = arith.constant 0 : i32
    %c0_i32_1 = arith.constant 0 : i32
    return %arg0, %c0_i32, %c0_i32_0 : i32, i32, i32
  }
}

</mosaic_0001>

<bundles_post_ra>
// kernel: cbam_layer.1
= control target key start
LH: loop header
LB: loop body
LE: loop exit
PB: predicated region body
PF: predicated region fallthrough
CT: control target
= control target key end

     0   :  { %9 = vsyncpa [#allocation3], 0  ;;  %s1307_s0 = inlined_call_operand.hbm [shape: f32[4,64,128], index: 0, kind: input, shape index: {}]   ;;  %s1308_s1 = inlined_call_operand.vmem [shape: f32[128,8], index: 1, kind: input, shape index: {}]   ;;  %s1309_s2 = inlined_call_operand.vmem [shape: f32[8,128], index: 2, kind: input, shape index: {}]   ;;  %s1310_s3 = inlined_call_operand.vmem [shape: f32[1,2], index: 3, kind: input, shape index: {}]   ;;  %s1311_s4 = inlined_call_operand.hbm [shape: f32[4,64,128], index: 4, kind: output, shape index: {}]  }
   0x1   :  { %11 = vsyncpa [#allocation3 + $0x1], 0 }
   0x2   :  { %12 = vsyncpa [#allocation4], 0 }
   0x3   :  { %14 = vsyncpa [#allocation4 + $0x1], 0  ;;  %s967_s15 = smov 0   ;;  %s969_s16 = smov 0  }
   0x4   :  { %s971_s17 = smov 0   ;;  %s973_s18 = smov 0  }
   0x5 LB: > { %s988_s19 = sadd.s32 4294967295, %s931_s18   ;;  %s661_s20 = sadd.s32 4294967294, %s931_s18   ;;  %s931_s18 = sphi %s973_s18, %s1325_s18   ;;  %s927_s17 = sphi %s971_s17, %s1324_s17   ;;  %s923_s16 = sphi %s969_s16, %s1323_s16   ;;  %s919_s15 = sphi %s967_s15, %s1322_s15  }
   0x6   : > { %s992_s21 = sadd.s32 1, %s931_s18   ;;  %s27_s22 = sadd.s32 1, %s927_s17 }
   0x7   : > { %s24_s23 = ssub.s32 %s931_s18, %s992_s21  ;;  %p34_p0 = scmp.ne.s32.totalorder %s927_s17, %s923_s16 }
   0x8   : > { %p25_p1 = scmp.eq.s32.totalorder %s24_s23, 0  ;;  %p35_p2 = scmp.eq.s32.totalorder %s931_s18, 0 }
   0x9   : > { %p40_p3 = scmp.ne.s32.totalorder %s923_s16, %s919_s15  ;;  %p41_p4 = scmp.eq.s32.totalorder %s988_s19, 0 }
   0xa   : > { %s1004_s24 = scalar_select %p25_p1, %s927_s17, %s27_s22  }
   0xb   : > { %p1006_p5 = por %p35_p2, %p34_p0  ;;  %p1010_p6 = por %p41_p4, %p40_p3 }
   0xc   : > { %p127_p7 = scmp.eq.s32.totalorder %s988_s19, 3  ;;  %p133_p8 = scmp.eq.s32.totalorder %s661_s20, 3 }
   0xd   : > { %s1315_s26 = scalar_select %p1010_p6, 1, 0 }
   0xe   : > { %p762_p9 = scmp.lt.s32.totalorder %s931_s18, 4  ;;  %p1016_p10 = por %p127_p7, %p34_p0 }
   0xf   : > { %p1020_p11 = por %p133_p8, %p40_p3  ;;  %s162_s29 = sand.u32 1, %s927_s17  }
  0x10   : > { %s1316_s27 = scalar_select %p1016_p10, 1, 0 }
  0x11   : > { %s1317_s28 = scalar_select %p1020_p11, 1, 0 }
  0x12   : > { %s685_s30 = sshll.u32 %s931_s18, 10  ;;  %s664_s5 = sshll.u32 %s162_s29, 6 }
  0x13   : > { %s1029_s8 = scalar_lea.hbm %s1307_s0, %s685_s30  ;;  %s166_s9 = scalar_lea.vmem [#allocation2], %s664_s5 }
  0x14   : > { %s173_s10 = sshll.u32 %s166_s9, 4  ;;  %p1033_p12 = pnand %p762_p9, %p1006_p5  ;;  %s1037_s10 = int_to_ptr.vmem [resolvable:$true] %s173_s10 }
  0x15   : > { %s1039_s12 = scalar_lea.sflag [#allocation3], %s162_s29  ;;  %s839_s13 = scalar_lea.hbm %s1029_s8, 1024 }
  0x16   : > { %p840_p13 = scmp.ne.s32.totalorder %s1029_s8, %s839_s13  ;;  %p841_p0 = pneg %p1033_p12 }
  0x17   : > { %s844_s22 = scalar_lea.hbm %s1307_s0, 4096  ;;  %p845_p3 = scmp.lt.s32.totalorder %s1029_s8, %s1307_s0 }
  0x18   : > { %p842_p1 = pnand %p841_p0, %p840_p13  ;;  %p846_p4 = scmp.lt.s32.totalorder %s844_s22, %s839_s13 }
  0x1a   : > { %p843_p2 = pneg %p842_p1  ;;  %p847_p5 = por %p846_p4, %p845_p3 }
  0x1c   : > { %p848_p7 = pnand %p847_p5, %p843_p2 }
  0x1e   : > { %851 = shalt.err (!%p848_p7)
}
  0x1f   : > { %s852_s29 = scalar_lea.vmem %s1037_s10, 1024  ;;  %s933_s30 = smov [#allocation2]  }
  0x20   : > { %p853_p8 = scmp.ne.s32.totalorder %s1037_s10, %s852_s29  ;;  %s857_s5 = sshll.u32 %s933_s30, 4  ;;  %s858_s5 = int_to_ptr.vmem [resolvable:$false] %s857_s5 }
  0x21   : > { %s859_s6 = scalar_lea.vmem %s858_s5, 2048  ;;  %p860_p1 = scmp.lt.s32.totalorder %s1037_s10, %s858_s5 }
  0x22   : > { %p855_p9 = pnand %p853_p8, %p841_p0  ;;  %p861_p11 = scmp.lt.s32.totalorder %s859_s6, %s852_s29 }
  0x24   : > { %p856_p13 = pneg %p855_p9  ;;  %p862_p10 = por %p861_p11, %p860_p1 }
  0x26   : > { %p863_p6 = pnand %p862_p10, %p856_p13 }
  0x28   : > { %866 = shalt.err (!%p863_p6)
}
  0x29   : > { %s934_s7 = smov 128   ;;  %s935_s9 = smov 8  }
  0x2a   : > { %757 = dma.hbm_to_vmem [thread:$0]  (!%p1033_p12), %s1029_s8, 1024, %s1037_s10, %s1039_s12, %s934_s7, %s934_s7, %s935_s9  }
  0x2b   : > { %p667_p0 = scmp.ge.s32.totalorder %s931_s18, 1  ;;  %p181_p2 = scmp.lt.s32.totalorder %s931_s18, 5 }
  0x2d   : > { %p182_p3 = pnand %p667_p0, %p181_p2 }
  0x2e   : > { %s1063_s13 = sand.u32 (!%p182_p3), 1, %s923_s16   ;;  %p1319_p6 = scmp.ne.s32.totalorder (!%p182_p3), %s1315_s26, 0 }
  0x2f   : > { %185 = sbr.rel (%p182_p3) target bundleno = 750 (0x2ee), region = 36  ;;  %s668_s14 = sshll.u32 (!%p182_p3), %s1063_s13, 6 }
  0x30   : > { %s188_s20 = scalar_lea.sflag (!%p182_p3), [#allocation3], %s1063_s13  ;;  %s191_s22 = scalar_lea.vmem (!%p182_p3), [#allocation2], %s668_s14 }
  0x34   : > { %910 = dma.done.wait (%p1319_p6), %s188_s20, 1024  }
  0x35   : > { %912 = vsyncadd (%p1319_p6), %s188_s20, 4294966272  ;;  %v936_v0 = vmov 0.0   ;;  %vm937_vm0 = vmmov 0   ;;  %v268_v1 = vld [vmem:[%s1308_s1 + $0x78] sm:$0xff]  ;;  %v267_v2 = vld [vmem:[%s1308_s1 + $0x70] sm:$0xff]  ;;  %vm251_vm1 = vcmask 1040384  }
  0x36   : > { %706 = vmatprep.subr.mxu0 %v936_v0  ;;  %738 = vmatprep.mubr.msk.f32.mxu0 %vm937_vm0, %v936_v0  ;;  %v266_v3 = vld [vmem:[%s1308_s1 + $0x68] sm:$0xff]  ;;  %v265_v4 = vld [vmem:[%s1308_s1 + $0x60] sm:$0xff]  ;;  %v264_v5 = vld [vmem:[%s1308_s1 + $0x58] sm:$0xff]  ;;  %vm341_vm2 = vcmask 64512   ;;  %s938_s25 = smov 127   ;;  %s1239_s5 = scalar_lea.vmem [#allocation5], %s668_s14 }
  0x37   : > { %741 = vmatprep.subr.mxu1 %v936_v0  ;;  %743 = vmatprep.mubr.msk.f32.mxu1 %vm937_vm0, %v936_v0  ;;  %v1094_v6 = vld [vmem:[%s191_s22] sm:$0xff]  ;;  %v1096_v7 = vld [vmem:[%s191_s22 + $0x8] sm:$0xff]  ;;  %v1099_v8 = vld [vmem:[%s191_s22 + $0x10] sm:$0xff]  ;;  %s686_s14 = sshll.u32 %s988_s19, 10  ;;  %s588_s6 = sshll.u32 %s1239_s5, 4  ;;  %s1263_s6 = int_to_ptr.vmem [resolvable:$true] %s588_s6 }
  0x38   : > { %707 = vmatpush3.msra.mxu0 %v268_v1  ;;  %v1101_v9 = vld [vmem:[%s191_s22 + $0x18] sm:$0xff]  ;;  %v1103_v10 = vld [vmem:[%s191_s22 + $0x20] sm:$0xff]  ;;  %v237_v11 = vadd.f32 %v1096_v7, %v1094_v6  ;;  %v1107_v12 = vld [vmem:[%s191_s22 + $0x28] sm:$0xff]  ;;  %s1261_s20 = scalar_lea.hbm %s1311_s4, %s686_s14  ;;  %s867_s8 = scalar_lea.vmem %s1263_s6, 1024 }
  0x39   : > { %708 = vmatprep.subr.mxu0 %v936_v0  ;;  %v1109_v13 = vld [vmem:[%s191_s22 + $0x30] sm:$0xff]  ;;  %v1111_v14 = vld [vmem:[%s191_s22 + $0x38] sm:$0xff]  ;;  %v224_v15 = vmax.f32 %v1094_v6, %v1103_v10  ;;  %v225_v17 = vmax.f32 %v1096_v7, %v1107_v12  ;;  %v262_v21 = vld [vmem:[%s1308_s1 + $0x48] sm:$0xff]  ;;  %s575_s22 = scalar_lea.sflag [#allocation4], %s1063_s13  ;;  %p868_p10 = scmp.ne.s32.totalorder %s1263_s6, %s867_s8 }
  0x3a   : > { %709 = vmatpush3.msra.mxu0 %v267_v2  ;;  %v263_v16 = vld [vmem:[%s1308_s1 + $0x50] sm:$0xff]  ;;  %v226_v18 = vmax.f32 %v1099_v8, %v1109_v13  ;;  %v227_v19 = vmax.f32 %v1101_v9, %v1111_v14  ;;  %v238_v20 = vadd.f32 %v237_v11, %v1099_v8  ;;  %v261_v25 = vld [vmem:[%s1308_s1 + $0x40] sm:$0xff]  ;;  %v260_v28 = vld [vmem:[%s1308_s1 + $0x38] sm:$0xff]  ;;  %v425_v2 = vlaneseq  ;;  %p1320_p11 = scmp.ne.s32.totalorder %s1316_s27, 0  ;;  %s939_s19 = smov [#allocation5]  }
  0x3b   : > { %710 = vmatprep.subr.mxu0 %v936_v0  ;;  %v228_v22 = vmax.f32 %v224_v15, %v225_v17  ;;  %v259_v31 = vld [vmem:[%s1308_s1 + $0x30] sm:$0xff]  ;;  %v258_v34 = vld [vmem:[%s1308_s1 + $0x28] sm:$0xff]  ;;  %v257_v37 = vld [vmem:[%s1308_s1 + $0x20] sm:$0xff]  ;;  %s871_s10 = sshll.u32 %s939_s19, 4  ;;  %s872_s10 = int_to_ptr.vmem [resolvable:$false] %s871_s10 }
  0x3c   : > { %711 = vmatpush3.msra.mxu0 %v266_v3  ;;  %v229_v23 = vmax.f32 %v226_v18, %v227_v19  ;;  %v239_v24 = vadd.f32 %v238_v20, %v1101_v9  ;;  %v256_v39 = vld [vmem:[%s1308_s1 + $0x18] sm:$0xff]  ;;  %v255_v42 = vld [vmem:[%s1308_s1 + $0x10] sm:$0xff]  ;;  %v254_v44 = vld [vmem:[%s1308_s1 + $0x8] sm:$0xff]  ;;  %v426_v3 = vshrl.u32 %v425_v2, 7  ;;  %p869_p12 = pnand %p868_p10, %p1320_p11  ;;  %s873_s11 = scalar_lea.vmem %s872_s10, 2048 }
  0x3d   : > { %712 = vmatprep.subr.mxu0 %v936_v0  ;;  %v253_v47 = vld [vmem:[%s1308_s1] sm:$0xff]  ;;  %p874_p5 = scmp.lt.s32.totalorder %s1263_s6, %s872_s10  ;;  %p875_p7 = scmp.lt.s32.totalorder %s873_s11, %s867_s8 }
  0x3e   : > { %713 = vmatpush3.msra.mxu0 %v265_v4  ;;  %v230_v26 = vmax.f32 %v228_v22, %v229_v23  ;;  %v240_v27 = vadd.f32 %v239_v24, %v1103_v10  ;;  %v340_v53 = vld [vmem:[%s1309_s2] sm:$0xff]  ;;  %v427_v4 = vsub.s32 0, %v426_v3  ;;  %p870_p4 = pneg %p869_p12 }
  0x3f   : > { %714 = vmatprep.subr.mxu0 %v936_v0  ;;  %742 = vmatpush3.msra.mxu1 %v340_v53  ;;  %v477_v57 = vld [vmem:[%s1310_s3] sm:$0x1]  ;;  %p876_p8 = por %p875_p7, %p874_p5 }
  0x40   : > { %715 = vmatpush3.msra.mxu0 %v264_v5  ;;  %v231_v29 = vrot.slane %v230_v26, 4  ;;  %v241_v30 = vadd.f32 %v240_v27, %v1107_v12  ;;  %489 = vrot.lane.b32.xlu0 %v477_v57, %s938_s25  ;;  %746 = vpush %v477_v57 }
  0x41   : > { %716 = vmatprep.subr.mxu0 %v936_v0  ;;  %p877_p9 = pnand %p876_p8, %p870_p4 }
  0x42   : > { %717 = vmatpush3.msra.mxu0 %v263_v16  ;;  %v232_v32 = vmax.f32 %v230_v26, %v231_v29  ;;  %v242_v33 = vadd.f32 %v241_v30, %v1109_v13 }
  0x43   : > { %718 = vmatprep.subr.mxu0 %v936_v0 }
  0x44   : > { %719 = vmatpush3.msra.mxu0 %v262_v21  ;;  %v233_v35 = vrot.slane %v232_v32, 2  ;;  %v243_v36 = vadd.f32 %v242_v33, %v1111_v14 }
  0x45   : > { %720 = vmatprep.subr.mxu0 %v936_v0 }
  0x46   : > { %721 = vmatpush3.msra.mxu0 %v261_v25  ;;  %v244_v38 = vrot.slane %v243_v36, 4  ;;  %v234_v40 = vmax.f32 %v232_v32, %v233_v35 }
  0x47   : > { %722 = vmatprep.subr.mxu0 %v936_v0 }
  0x48   : > { %723 = vmatpush3.msra.mxu0 %v260_v28  ;;  %v245_v41 = vadd.f32 %v244_v38, %v243_v36  ;;  %v235_v45 = vrot.slane %v234_v40, 1 }
  0x49   : > { %724 = vmatprep.subr.mxu0 %v936_v0 }
  0x4a   : > { %725 = vmatpush3.msra.mxu0 %v259_v31  ;;  %v246_v43 = vrot.slane %v245_v41, 2  ;;  %v236_v49 = vmax.f32 %v234_v40, %v235_v45 }
  0x4b   : > { %726 = vmatprep.subr.mxu0 %v936_v0 }
  0x4c   : > { %727 = vmatpush3.msra.mxu0 %v258_v34  ;;  %v247_v46 = vadd.f32 %v246_v43, %v245_v41 }
  0x4d   : > { %728 = vmatprep.subr.mxu0 %v936_v0 }
  0x4e   : > { %729 = vmatpush3.msra.mxu0 %v257_v37  ;;  %v248_v48 = vrot.slane %v247_v46, 1 }
  0x4f   : > { %730 = vmatprep.subr.mxu0 %v936_v0 }
  0x50   : > { %731 = vmatpush3.msra.mxu0 %v256_v39  ;;  %v249_v50 = vadd.f32 %v248_v48, %v247_v46 }
  0x51   : > { %732 = vmatprep.subr.mxu0 %v936_v0 }
  0x52   : > { %733 = vmatpush3.msra.mxu0 %v255_v42  ;;  %v250_v51 = vmul.f32 0.015625, %v249_v50 }
  0x53   : > { %734 = vmatprep.subr.mxu0 %v936_v0 }
  0x54   : > { %735 = vmatpush3.msra.mxu0 %v254_v44  ;;  %v252_v52 = vsel %vm251_vm1, %v236_v49, %v250_v51 }
  0x55   : > { %736 = vmatprep.subr.mxu0 %v936_v0 }
  0x56   : > { %737 = vmatpush3.msra.mxu0 %v253_v47 }
  0x57   : > { %739 = vmatmul.mubr.f32.vlgmr.msra.gmra.mxu0 %v252_v52 }
  0x71   : > { %s747_s29 = spop %746 }
  0xb2   : > { %v490_v58 = vpop.permute.xlu0 %489 }
  0xb3   : > { %748 = vpush %v490_v58 }
  0xe4   : > { %s749_s30 = spop %748 }
  0xe5   : > { %v1220_v21 = vstv %s749_s30 }
 0x117   : > { %v335_v54 = vpop.f32.mrf.mxu0 }
 0x118   : > { %v339_v55 = vmax.f32 %v335_v54, 0.0 }
 0x119   : > { %v740_v56 = vpop.f32.mrf.mxu0 }
 0x11a   : > { %744 = vmatmul.mubr.msk.f32.vlgmr.msra.gmra.mxu1 %vm341_vm2, %v339_v55 }
 0x1da   : > { %v411_v59 = vpop.f32.mrf.mxu1 }
 0x1db   : > { %v416_v60 = vrot.slane %v411_v59, 1 }
 0x1dc   : > { %v745_v61 = vpop.f32.mrf.mxu1 }
 0x1dd   : > { %v418_v62 = vadd.f32 %v416_v60, %v411_v59 }
 0x1df   : > { %v671_v63 = vmul.f32 -1.442695, %v418_v62 }
 0x1e1   : > { %803 = vpow2.f32 %v671_v63 }
 0x1ee   : > { %v804_v0 = vpop.eup %803 }
 0x1ef   : > { %v422_v1 = vadd.f32 1.0, %v804_v0 }
 0x1f1   : > { %805 = vrcp.f32 %v422_v1 }
 0x1fe   : > { %v806_v5 = vpop.eup %805 }
 0x1ff   : > { %v428_v11 = vrot.slane %v806_v5, %v427_v4 }
 0x201   : > { %v1179_v15 = vmul.f32 %v428_v11, %v1096_v7  ;;  %v1182_v16 = vmul.f32 %v428_v11, %v1094_v6  ;;  %v1187_v17 = vmul.f32 %v428_v11, %v1099_v8  ;;  %v1192_v18 = vmul.f32 %v428_v11, %v1101_v9 }
 0x202   : > { %v1195_v7 = vmul.f32 %v428_v11, %v1103_v10  ;;  %v1200_v6 = vmul.f32 %v428_v11, %v1109_v13  ;;  %v1205_v8 = vmul.f32 %v428_v11, %v1107_v12  ;;  %v1210_v9 = vmul.f32 %v428_v11, %v1111_v14 }
 0x203   : > { %455 = vadd.xlane.f32.xlu1 %v1179_v15  ;;  %453 = vadd.xlane.f32.xlu0 %v1182_v16  ;;  %v1218_v13 = vstv %s747_s29 }
 0x207   : > { %457 = vadd.xlane.f32.xlu1 %v1187_v17  ;;  %441 = vmax.xlane.f32.xlu0 %v1187_v17 }
 0x20b   : > { %459 = vadd.xlane.f32.xlu1 %v1192_v18  ;;  %445 = vmax.xlane.f32.xlu0 %v1195_v7 }
 0x20f   : > { %461 = vadd.xlane.f32.xlu1 %v1195_v7  ;;  %449 = vmax.xlane.f32.xlu0 %v1200_v6 }
 0x213   : > { %463 = vadd.xlane.f32.xlu1 %v1205_v8 }
 0x217   : > { %465 = vadd.xlane.f32.xlu1 %v1200_v6 }
 0x21b   : > { %467 = vadd.xlane.f32.xlu1 %v1210_v9 }
 0x21f   : > { %437 = vmax.xlane.f32.xlu1 %v1182_v16 }
 0x223   : > { %439 = vmax.xlane.f32.xlu1 %v1179_v15 }
 0x227   : > { %443 = vmax.xlane.f32.xlu1 %v1192_v18 }
 0x22b   : > { %447 = vmax.xlane.f32.xlu1 %v1205_v8 }
 0x22f   : > { %451 = vmax.xlane.f32.xlu1 %v1210_v9 }
 0x28c   : > { %v456_v10 = vpop.xlane.xlu1 %455  ;;  %v454_v12 = vpop.xlane.xlu0 %453 }
 0x28d   : > { %v469_v41 = vmul.f32 0.0078125, %v454_v12  ;;  %v470_v47 = vmul.f32 0.0078125, %v456_v10 }
 0x28f   : > { %v494_v49 = vmul.f32 %v1220_v21, %v469_v41  ;;  %v495_v54 = vmul.f32 %v1220_v21, %v470_v47 }
 0x290   : > { %v458_v14 = vpop.xlane.xlu1 %457  ;;  %v442_v19 = vpop.xlane.xlu0 %441 }
 0x291   : > { %v471_v20 = vmul.f32 0.0078125, %v458_v14  ;;  %v482_v23 = vmul.f32 %v1218_v13, %v442_v19 }
 0x293   : > { %v496_v22 = vmul.f32 %v1220_v21, %v471_v20 }
 0x294   : > { %v460_v24 = vpop.xlane.xlu1 %459  ;;  %v446_v27 = vpop.xlane.xlu0 %445 }
 0x295   : > { %v504_v25 = vadd.f32 %v496_v22, %v482_v23  ;;  %v484_v30 = vmul.f32 %v1218_v13, %v446_v27  ;;  %v472_v51 = vmul.f32 0.0078125, %v460_v24 }
 0x297   : > { %v674_v26 = vmul.f32 -1.442695, %v504_v25  ;;  %v497_v59 = vmul.f32 %v1220_v21, %v472_v51 }
 0x298   : > { %v462_v28 = vpop.xlane.xlu1 %461  ;;  %v450_v35 = vpop.xlane.xlu0 %449 }
 0x299   : > { %807 = vpow2.f32 %v674_v26  ;;  %v473_v29 = vmul.f32 0.0078125, %v462_v28  ;;  %v486_v38 = vmul.f32 %v1218_v13, %v450_v35 }
 0x29b   : > { %v498_v31 = vmul.f32 %v1220_v21, %v473_v29 }
 0x29c   : > { %v464_v32 = vpop.xlane.xlu1 %463 }
 0x29d   : > { %v506_v33 = vadd.f32 %v498_v31, %v484_v30  ;;  %v474_v61 = vmul.f32 0.0078125, %v464_v32 }
 0x29f   : > { %v676_v34 = vmul.f32 -1.442695, %v506_v33  ;;  %v499_v2 = vmul.f32 %v1220_v21, %v474_v61 }
 0x2a0   : > { %v466_v36 = vpop.xlane.xlu1 %465 }
 0x2a1   : > { %809 = vpow2.f32 %v676_v34  ;;  %v475_v37 = vmul.f32 0.0078125, %v466_v36 }
 0x2a3   : > { %v500_v39 = vmul.f32 %v1220_v21, %v475_v37 }
 0x2a4   : > { %v468_v40 = vpop.xlane.xlu1 %467 }
 0x2a5   : > { %v508_v42 = vadd.f32 %v500_v39, %v486_v38  ;;  %v476_v3 = vmul.f32 0.0078125, %v468_v40 }
 0x2a6   : > { %v808_v43 = vpop.eup %807 }
 0x2a7   : > { %v536_v44 = vadd.f32 1.0, %v808_v43  ;;  %v678_v45 = vmul.f32 -1.442695, %v508_v42  ;;  %v501_v22 = vmul.f32 %v1220_v21, %v476_v3 }
 0x2a8   : > { %v438_v46 = vpop.xlane.xlu1 %437 }
 0x2a9   : > { %811 = vrcp.f32 %v536_v44  ;;  %v480_v48 = vmul.f32 %v1218_v13, %v438_v46 }
 0x2aa   : > { %813 = vpow2.f32 %v678_v45 }
 0x2ab   : > { %v502_v50 = vadd.f32 %v494_v49, %v480_v48 }
 0x2ac   : > { %v440_v52 = vpop.xlane.xlu1 %439 }
 0x2ad   : > { %v672_v53 = vmul.f32 -1.442695, %v502_v50  ;;  %v481_v55 = vmul.f32 %v1218_v13, %v440_v52 }
 0x2ae   : > { %v810_v56 = vpop.eup %809 }
 0x2af   : > { %v538_v57 = vadd.f32 1.0, %v810_v56  ;;  %815 = vpow2.f32 %v672_v53  ;;  %v503_v58 = vadd.f32 %v495_v54, %v481_v55 }
 0x2b0   : > { %v444_v60 = vpop.xlane.xlu1 %443 }
 0x2b1   : > { %817 = vrcp.f32 %v538_v57  ;;  %v673_v62 = vmul.f32 -1.442695, %v503_v58  ;;  %v483_v63 = vmul.f32 %v1218_v13, %v444_v60 }
 0x2b3   : > { %819 = vpow2.f32 %v673_v62  ;;  %v505_v0 = vadd.f32 %v497_v59, %v483_v63 }
 0x2b4   : > { %v448_v1 = vpop.xlane.xlu1 %447 }
 0x2b5   : > { %v675_v4 = vmul.f32 -1.442695, %v505_v0  ;;  %v485_v5 = vmul.f32 %v1218_v13, %v448_v1 }
 0x2b6   : > { %v812_v11 = vpop.eup %811 }
 0x2b7   : > { %v814_v10 = vpop.eup %813  ;;  %v560_v12 = vmul.f32 %v812_v11, %v1187_v17  ;;  %821 = vpow2.f32 %v675_v4  ;;  %v507_v14 = vadd.f32 %v499_v2, %v485_v5 }
 0x2b8   : > { %v540_v19 = vadd.f32 1.0, %v814_v10  ;;  %v452_v20 = vpop.xlane.xlu1 %451 }
 0x2b9   : > { %568 = vst [vmem:[%s1239_s5 + $0x10] sm:$0xff] %v560_v12  ;;  %v677_v23 = vmul.f32 -1.442695, %v507_v14  ;;  %v487_v24 = vmul.f32 %v1218_v13, %v452_v20 }
 0x2ba   : > { %823 = vrcp.f32 %v540_v19 }
 0x2bb   : > { %825 = vpow2.f32 %v677_v23  ;;  %v509_v25 = vadd.f32 %v501_v22, %v487_v24 }
 0x2bc   : > { %v816_v26 = vpop.eup %815 }
 0x2bd   : > { %v534_v17 = vadd.f32 1.0, %v816_v26  ;;  %v679_v27 = vmul.f32 -1.442695, %v509_v25 }
 0x2be   : > { %v818_v28 = vpop.eup %817 }
 0x2bf   : > { %v562_v29 = vmul.f32 %v818_v28, %v1195_v7  ;;  %827 = vrcp.f32 %v534_v17 }
 0x2c0   : > { %v820_v30 = vpop.eup %819  ;;  %829 = vpow2.f32 %v679_v27 }
 0x2c1   : > { %570 = vst [vmem:[%s1239_s5 + $0x20] sm:$0xff] %v562_v29  ;;  %v535_v31 = vadd.f32 1.0, %v820_v30 }
 0x2c3   : > { %831 = vrcp.f32 %v535_v31 }
 0x2c4   : > { %v822_v21 = vpop.eup %821 }
 0x2c5   : > { %v537_v32 = vadd.f32 1.0, %v822_v21 }
 0x2c7   : > { %v824_v13 = vpop.eup %823  ;;  %833 = vrcp.f32 %v537_v32 }
 0x2c8   : > { %v826_v33 = vpop.eup %825  ;;  %v564_v34 = vmul.f32 %v824_v13, %v1200_v6 }
 0x2c9   : > { %v539_v35 = vadd.f32 1.0, %v826_v33 }
 0x2ca   : > { %572 = vst [vmem:[%s1239_s5 + $0x30] sm:$0xff] %v564_v34 }
 0x2cb   : > { %835 = vrcp.f32 %v539_v35 }
 0x2cc   : > { %v828_v7 = vpop.eup %827 }
 0x2cd   : > { %v830_v36 = vpop.eup %829  ;;  %v558_v37 = vmul.f32 %v828_v7, %v1182_v16 }
 0x2ce   : > { %v541_v38 = vadd.f32 1.0, %v830_v36 }
 0x2cf   : > { %566 = vst [vmem:[%s1239_s5] sm:$0xff] %v558_v37 }
 0x2d0   : > { %v832_v39 = vpop.eup %831  ;;  %837 = vrcp.f32 %v541_v38 }
 0x2d1   : > { %v559_v40 = vmul.f32 %v832_v39, %v1179_v15 }
 0x2d3   : > { %567 = vst [vmem:[%s1239_s5 + $0x8] sm:$0xff] %v559_v40 }
 0x2d4   : > { %v834_v6 = vpop.eup %833 }
 0x2d5   : > { %v561_v41 = vmul.f32 %v834_v6, %v1192_v18 }
 0x2d7   : > { %569 = vst [vmem:[%s1239_s5 + $0x18] sm:$0xff] %v561_v41 }
 0x2d8   : > { %v836_v42 = vpop.eup %835 }
 0x2d9   : > { %v563_v43 = vmul.f32 %v836_v42, %v1205_v8 }
 0x2db   : > { %571 = vst [vmem:[%s1239_s5 + $0x28] sm:$0xff] %v563_v43 }
 0x2dd   : > { %v838_v16 = vpop.eup %837 }
 0x2de   : > { %v565_v15 = vmul.f32 %v838_v16, %v1210_v9 }
 0x2e0   : > { %573 = vst [vmem:[%s1239_s5 + $0x38] sm:$0xff] %v565_v15 }
 0x2e1   : > { %880 = shalt.err (!%p877_p9)
}
 0x2e2   : > { %s881_s12 = scalar_lea.hbm %s1261_s20, 1024  ;;  %s885_s25 = scalar_lea.hbm %s1311_s4, 4096 }
 0x2e3   : > { %p882_p13 = scmp.ne.s32.totalorder %s1261_s20, %s881_s12  ;;  %p886_p2 = scmp.lt.s32.totalorder %s1261_s20, %s1311_s4 }
 0x2e4   : > { %p887_p3 = scmp.lt.s32.totalorder %s885_s25, %s881_s12 }
 0x2e5   : > { %p883_p1 = pnand %p882_p13, %p1320_p11 }
 0x2e6   : > { %p888_p6 = por %p887_p3, %p886_p2 }
 0x2e7   : > { %p884_p0 = pneg %p883_p1 }
 0x2e9   : > { %p889_p10 = pnand %p888_p6, %p884_p0 }
 0x2eb   : > { %892 = shalt.err (!%p889_p10)
}
 0x2ec   : > { %s940_s5 = smov 128   ;;  %s941_s14 = smov 8  }
 0x2ed   : > { %752 = dma.vmem_to_hbm [thread:$0]  (%p1320_p11), %s1263_s6, 1024, %s1261_s20, %s575_s22, %s940_s5, %s940_s5, %s941_s14  }
 0x2ee PF: > { %p763_p12 = scmp.ge.s32.totalorder %s931_s18, 2  ;;  %s603_s7 = sand.u32 1, %s919_s15  }
 0x2ef   : > { %p1321_p4 = scmp.ne.s32.totalorder %s1317_s28, 0  ;;  %s604_s9 = scalar_lea.sflag [#allocation4], %s603_s7 }
 0x2f1   : > { %p759_p5 = pnand %p763_p12, %p1321_p4 }
 0x2f3   : > { %p760_p7 = pneg %p759_p5 }
 0x2f5   : > { %914 = dma.done.wait (%p760_p7), %s604_s9, 1024  }
 0x2f6   : > { %916 = vsyncadd (%p760_p7), %s604_s9, 4294966272  ;;  %p17_p8 = scmp.ge.s32.totalorder %s992_s21, 6   ;;  %s1322_s15 = smov %s923_s16 }
 0x2f7   : > { %s1323_s16 = smov %s927_s17  ;;  %s1324_s17 = smov %s1004_s24 }
 0x2f8   : > { %s1325_s18 = smov %s992_s21  ;;  %19 = sbr.rel (!%p17_p8) target bundleno = 5 (0x5), region = 81 }
 0x2fd   :  { %609 = vsyncpa [#allocation3], 1 }
 0x2fe   :  { %611 = vsyncpa [#allocation3 + $0x1], 1 }
 0x2ff   :  { %612 = vsyncpa [#allocation4], 1 }
 0x300   :  { %614 = vsyncpa [#allocation4 + $0x1], 1 }

</bundles_post_ra>
